<compile_context>
chip_gen: v6e
topology: v6e:2x2x1
jax: 0.10.0
libtpu: 0.0.40
codegen_flags: <defaults>
</compile_context>

<pallas_src>
import itertools
import functools

import numpy as np
import jax
import jax.numpy as jnp
from jax import lax
from jax.experimental import pallas as pl
from jax.experimental.pallas import tpu as pltpu

NEG = -1.0e30
_LANE = 128


def _round_up(x, m):
    return ((x + m - 1) // m) * m


@functools.lru_cache(maxsize=1)
def _vmem_plan():
    """Return (per-step tile budget, vmem_limit_bytes, max time tile), generation aware."""
    cap = 128 * 1024 * 1024
    try:
        info = pltpu.get_tpu_info()
        cap = int(getattr(info, "vmem_capacity_bytes", cap))
    except Exception:       # pragma: no cover - conservative fallback
        pass
    if cap >= 100 * 1024 * 1024:
        # v5e / v6e: 128 MiB VMEM per TensorCore -> big tiles, high scoped limit
        return 40 * 1024 * 1024, 96 * 1024 * 1024, 1024
    # v7x: 64 MiB per TensorCore -> keep headroom for double buffering + compiler scratch
    return 16 * 1024 * 1024, 40 * 1024 * 1024, 512


def _choose_time_tiling(T, row_bytes, budget, max_tile):
    """Pick (t_tile, T_pad).  Prefers a single full-extent block or a divisor of T
    (no padded copy / extra HBM pass over the logits); pads only when unavoidable."""
    limit = max(8, min(max_tile, (budget // max(1, row_bytes)) // 8 * 8))
    if T <= limit:
        return T, T
    for cand in range(limit, 7, -8):          # largest multiple-of-8 divisor of T
        if T % cand == 0:
            return cand, T
    return limit, _round_up(T, limit)


def _pick_group(n):
    """Sequences packed per alpha-recursion grid step (sublane rows).
    Multiple of 8; chosen so small batches still produce >= 2 groups (v7x megacore)."""
    if n <= 8:
        return 8
    return max(8, min(32, _round_up((n + 1) // 2, 8)))


# --------------------------------------------------------------------------
# pltpu.roll direction probe (XLU lane rotate); falls back to concatenate.
# --------------------------------------------------------------------------
_SHIFT_FN = None


def _get_shift_right():
    """Return shift_right(x, k): value at lane s becomes x[..., s-k] (left lanes garbage,
    callers mask the first k lanes with NEG)."""
    global _SHIFT_FN
    if _SHIFT_FN is not None:
        return _SHIFT_FN

    def _concat_shift(x, k):
        fill = jnp.full(x.shape[:-1] + (k,), NEG, x.dtype)
        return jnp.concatenate([fill, x[..., :-k]], axis=-1)

    try:
        def _probe(o_ref):
            o_ref[...] = pltpu.roll(
                lax.broadcasted_iota(jnp.float32, (8, _LANE), 1), 1, 1)

        probe = pl.pallas_call(
            _probe, out_shape=jax.ShapeDtypeStruct((8, _LANE), jnp.float32))()
        rolls_right = bool(np.asarray(jax.device_get(probe))[0, 1] == 0.0)

        def _roll_shift(x, k):
            n = x.shape[-1]
            sh = k if rolls_right else (n - k) % n
            return pltpu.roll(x, sh, len(x.shape) - 1)

        _SHIFT_FN = _roll_shift
    except Exception:                     # pragma: no cover - conservative fallback
        _SHIFT_FN = _concat_shift
    return _SHIFT_FN


# --------------------------------------------------------------------------
# Kernel A: fused log_softmax (dim=2) + argmax (dim=2), time axis tiled
# --------------------------------------------------------------------------
def _lsm_argmax_kernel(x_ref, logp_ref, am_ref):
    x = x_ref[0]                                          # (t_tile, C)
    m = jnp.max(x, axis=-1, keepdims=True)
    e = x - m
    logp_ref[...] = (e - jnp.log(jnp.sum(jnp.exp(e), axis=-1, keepdims=True)))[None]
    c = x.shape[-1]
    iota_c = lax.broadcasted_iota(jnp.int32, x.shape, 1)
    idx = jnp.min(jnp.where(x >= m, iota_c, c), axis=-1, keepdims=True)
    am_ref[...] = idx.astype(jnp.int32)[None]             # (1, t_tile, 1)


def log_softmax_and_argmax(logits):
    logits = jnp.asarray(logits, jnp.float32)
    B, T, C = logits.shape
    budget, vmem_limit, max_tile = _vmem_plan()
    t_tile, T_pad = _choose_time_tiling(T, row_bytes=20 * C, budget=budget,
                                        max_tile=max_tile)
    x = logits
    if T_pad != T:
        x = jnp.zeros((B, T_pad, C), jnp.float32).at[:, :T, :].set(logits)
    logp, am = pl.pallas_call(
        _lsm_argmax_kernel,
        out_shape=(jax.ShapeDtypeStruct((B, T_pad, C), jnp.float32),
                   jax.ShapeDtypeStruct((B, T_pad, 1), jnp.int32)),
        grid_spec=pltpu.PrefetchScalarGridSpec(
            num_scalar_prefetch=0,
            grid=(B, T_pad // t_tile),
            in_specs=[pl.BlockSpec((1, t_tile, C), lambda b, t: (b, t, 0))],
            out_specs=[pl.BlockSpec((1, t_tile, C), lambda b, t: (b, t, 0)),
                       pl.BlockSpec((1, t_tile, 1), lambda b, t: (b, t, 0))]),
        compiler_params=pltpu.CompilerParams(
            dimension_semantics=("parallel", "parallel"),
            vmem_limit_bytes=vmem_limit),
    )(x)
    return logp[:, :T, :], am[:, :T, 0]


# --------------------------------------------------------------------------
# Kernel B: fused CTC forward (log-softmax + extended-label gather + alpha
# recursion), G sequences per grid step packed on the sublane axis.
# --------------------------------------------------------------------------
def _ctc_fused_kernel(gmax_ref, x_ref, ext_ref, allow2_ref, init_ref, end_ref,
                      tb_ref, out_ref, onehot_ref, lp_ref, alpha_ref, *,
                      from_log_probs, shift_right):
    g = pl.program_id(0)
    tt = pl.program_id(1)
    num_tt = pl.num_programs(1)
    n_rows, s_pad = alpha_ref.shape
    t_tile = lp_ref.shape[0]
    c = x_ref.shape[-1]

    # --- build the per-row one-hot gather matrices once per sequence group
    # (hoisted out of the time loop; time axis is the inner "arbitrary" grid dim).
    @pl.when(tt == 0)
    def _():
        iota_c = lax.broadcasted_iota(jnp.int32, (c, s_pad), 0)
        for r in range(n_rows):
            ext_row = ext_ref[r:r + 1, :]                      # (1, S_pad) int32
            onehot_ref[r] = (iota_c == ext_row).astype(jnp.bfloat16)

    max_tb = gmax_ref[g]                  # longest sequence in this group
    t_base = tt * t_tile

    # label-only terms, loop invariant (hoisted out of the serial recursion)
    lane = lax.broadcasted_iota(jnp.int32, (n_rows, s_pad), 1)
    shift1_add = jnp.where(lane < 1, NEG, 0.0)
    shift2_add = jnp.where(lane < 2, NEG, 0.0) + allow2_ref[...]
    tb = tb_ref[...]                      # (G, S_pad) int32 per-row T_b

    @pl.when(t_base < max_tb)             # skip time tiles fully beyond this group
    def _():
        x = x_ref[...]                    # (G, t_tile, C)
        if from_log_probs:
            logp = x
        else:
            m = jnp.max(x, axis=-1, keepdims=True)
            e = x - m
            logp = e - jnp.log(jnp.sum(jnp.exp(e), axis=-1, keepdims=True))

        # Extended-label gather lp[t, r, s] = logp[r, t, ext[r, s]] via one-hot
        # bf16 hi/lo MXU dots (single nonzero per column -> ~exact f32 gather),
        # written directly into the (t_tile, G, S_pad) layout so the serial loop
        # below does a single aligned (G, S_pad) load per timestep.
        for r in range(n_rows):
            row = logp[r]                                      # (t_tile, C) f32
            hi = row.astype(jnp.bfloat16)
            lo = (row - hi.astype(jnp.float32)).astype(jnp.bfloat16)
            oh = onehot_ref[r]                                 # (C, S_pad) bf16
            res = (jnp.dot(hi, oh, preferred_element_type=jnp.float32) +
                   jnp.dot(lo, oh, preferred_element_type=jnp.float32))
            lp_ref[:, r:r + 1, :] = res[:, None, :]

        @pl.when(tt == 0)
        def _():
            alpha_ref[...] = jnp.where(init_ref[...] > 0.5, lp_ref[0], NEG)

        def body(i, alpha):
            lp_t = lp_ref[i]                                   # (G, S_pad) aligned load
            a1 = shift_right(alpha, 1) + shift1_add
            a2 = shift_right(alpha, 2) + shift2_add
            mmax = jnp.maximum(jnp.maximum(alpha, a1), a2)
            lse = mmax + jnp.log(jnp.exp(alpha - mmax) +
                                 jnp.exp(a1 - mmax) +
                                 jnp.exp(a2 - mmax))
            new = lse + lp_t
            t_glob = t_base + i
            active = (t_glob >= 1) & (t_glob < tb)             # per-row freeze beyond T_b
            return jnp.where(active, new, alpha)

        alpha_ref[...] = lax.fori_loop(0, t_tile, body, alpha_ref[...], unroll=4)

    @pl.when(tt == num_tt - 1)
    def _():
        alpha = alpha_ref[...]
        af = jnp.where(end_ref[...] > 0.5, alpha, NEG)
        m = jnp.max(af, axis=-1, keepdims=True)
        total = m + jnp.log(jnp.sum(jnp.exp(af - m), axis=-1, keepdims=True))
        out_ref[...] = jnp.broadcast_to(-total, (n_rows, _LANE))[None]


def ctc_loss(logits, targets, logits_lengths, targets_lengths, blank_idx=0,
             *, inputs_are_log_probs=False, max_time_tile=None, group_size=None):
    """Per-sample CTC negative log-likelihood (== WarpCTCLoss(reduce=False))."""
    logits = jnp.asarray(logits, jnp.float32)
    targets = jnp.asarray(targets, jnp.int32)
    if targets.ndim == 1:
        targets = targets[None, :]
    N, T, C = logits.shape
    L = int(targets.shape[1])
    S_pad = _round_up(2 * L + 1, _LANE)

    G = group_size if group_size is not None else _pick_group(N)
    NG = -(-N // G)
    N_pad = NG * G

    budget, vmem_limit, max_tile = _vmem_plan()
    if max_time_tile is not None:
        max_tile = int(max_time_tile)
    # per-time-row VMEM: x block (double buffered) + gathered-lp scratch
    row_bytes = G * (8 * C + 4 * S_pad)
    # TODO(synk): for very large vocabularies the (G, C, S_pad) one-hot scratch would
    # need to be rebuilt per tile or G reduced; typical CTC vocabs fit comfortably.
    t_tile, T_pad = _choose_time_tiling(T, row_bytes, budget, max_tile)
    num_tt = T_pad // t_tile

    ll = jnp.clip(jnp.asarray(np.asarray(logits_lengths), jnp.int32), 1, T)
    tl = jnp.clip(jnp.asarray(np.asarray(targets_lengths), jnp.int32), 0, L)
    ll_p = jnp.ones((N_pad,), jnp.int32).at[:N].set(ll)
    tl_p = jnp.zeros((N_pad,), jnp.int32).at[:N].set(tl)
    gmax = jnp.max(ll_p.reshape(NG, G), axis=1).astype(jnp.int32)   # per-group max T_b

    # avoid an extra full HBM pass: only copy/pad when the shapes force it
    if N_pad == N and T_pad == T:
        x_p = logits
    else:
        x_p = jnp.zeros((N_pad, T_pad, C), jnp.float32).at[:N, :T, :].set(logits)
    tg_p = jnp.zeros((N_pad, max(L, 1)), jnp.int32).at[:N, :L].set(targets)

    # extended (blank-interleaved) labels padded to S_pad lanes + label-only masks
    s_idx = jnp.arange(S_pad, dtype=jnp.int32)
    ext = jnp.full((N_pad, S_pad), blank_idx, jnp.int32)
    if L > 0:
        ext = ext.at[:, 1:2 * L:2].set(tg_p[:, :L])
    sb = 2 * tl_p + 1                                              # (N_pad,)

    allow2 = ((ext != blank_idx) & (s_idx[None, :] >= 2) &
              (ext != jnp.roll(ext, 2, axis=1)))
    allow2_add = jnp.where(allow2, 0.0, NEG).astype(jnp.float32)
    init_sel = (s_idx[None, :] < jnp.minimum(2, sb)[:, None]).astype(jnp.float32)
    end_sel = ((s_idx[None, :] == (sb - 1)[:, None]) |
               ((sb[:, None] >= 2) & (s_idx[None, :] == (sb - 2)[:, None]))
               ).astype(jnp.float32)
    tb_lane = jnp.broadcast_to(ll_p[:, None], (N_pad, S_pad)).astype(jnp.int32)

    def x_index_map(g, t, gmax_ref):
        # clamp so time tiles past the group's longest sequence re-use the last
        # fetched block (no HBM read, and the kernel skips the compute anyway)
        last = (gmax_ref[g] - 1) // t_tile
        return (g, jnp.minimum(t, last), 0)

    kernel = functools.partial(_ctc_fused_kernel,
                               from_log_probs=inputs_are_log_probs,
                               shift_right=_get_shift_right())
    out = pl.pallas_call(
        kernel,
        out_shape=jax.ShapeDtypeStruct((NG, G, _LANE), jnp.float32),
        grid_spec=pltpu.PrefetchScalarGridSpec(
            num_scalar_prefetch=1,
            grid=(NG, num_tt),
            in_specs=[
                pl.BlockSpec((G, t_tile, C), x_index_map),
                pl.BlockSpec((G, S_pad), lambda g, t, gm: (g, 0)),
                pl.BlockSpec((G, S_pad), lambda g, t, gm: (g, 0)),
                pl.BlockSpec((G, S_pad), lambda g, t, gm: (g, 0)),
                pl.BlockSpec((G, S_pad), lambda g, t, gm: (g, 0)),
                pl.BlockSpec((G, S_pad), lambda g, t, gm: (g, 0)),
            ],
            out_specs=pl.BlockSpec((1, G, _LANE), lambda g, t, gm: (g, 0, 0)),
            scratch_shapes=[
                pltpu.VMEM((G, C, S_pad), jnp.bfloat16),      # per-group one-hot cache
                pltpu.VMEM((t_tile, G, S_pad), jnp.float32),  # gathered lp, loop layout
                pltpu.VMEM((G, S_pad), jnp.float32),          # alpha state
            ]),
        compiler_params=pltpu.CompilerParams(
            dimension_semantics=("parallel", "arbitrary"),
            vmem_limit_bytes=vmem_limit),
    )(gmax, x_p, ext, allow2_add, init_sel, end_sel, tb_lane)

    return out[:, :, 0].reshape(-1)[:N]


# --------------------------------------------------------------------------
# Host-side helpers (data-dependent control flow)
# --------------------------------------------------------------------------
def _viterbi_align_single(logp, target, T_b, L_b, blank_idx):
    S = 2 * L_b + 1
    ext = np.full(S, blank_idx, dtype=np.int64)
    if L_b > 0:
        ext[1::2] = target[:L_b]
    delta = np.full((T_b, S), NEG, dtype=np.float64)
    psi = np.zeros((T_b, S), dtype=np.int64)
    delta[0, 0] = logp[0, ext[0]]
    if S > 1:
        delta[0, 1] = logp[0, ext[1]]
    for t in range(1, T_b):
        for s in range(S):
            cands = [delta[t - 1, s]]
            prevs = [s]
            if s >= 1:
                cands.append(delta[t - 1, s - 1]); prevs.append(s - 1)
            if s >= 2 and ext[s] != blank_idx and ext[s] != ext[s - 2]:
                cands.append(delta[t - 1, s - 2]); prevs.append(s - 2)
            k = int(np.argmax(cands))
            delta[t, s] = logp[t, ext[s]] + cands[k]
            psi[t, s] = prevs[k]
    s = S - 1
    if S > 1 and delta[T_b - 1, S - 2] > delta[T_b - 1, S - 1]:
        s = S - 2
    aligned = np.full(logp.shape[0], blank_idx, dtype=np.int64)
    for t in range(T_b - 1, -1, -1):
        aligned[t] = ext[s]
        s = psi[t, s]
    return aligned


def get_alignment_3d(logp, targets, logits_lengths, targets_lengths, blank_idx):
    B, T, _ = logp.shape
    out = np.zeros((B, T), dtype=np.int64)
    for i in range(B):
        out[i] = _viterbi_align_single(logp[i], targets[i],
                                       int(logits_lengths[i]),
                                       int(targets_lengths[i]), blank_idx)
    return out


# --------------------------------------------------------------------------
# Module
# --------------------------------------------------------------------------
class CTCLossSegmentedPallas:
    """Pallas/JAX re-implementation of CTCLossSegmented.forward (no learnable params)."""

    def __init__(self, space_idx, blank_idx=0, reduce=False, min_word_length=3):
        self.reduce = reduce          # stored, unused in forward (same as original)
        self.space_idx = space_idx
        self.blank_idx = blank_idx
        self.min_word_length = min_word_length

    def forward(self, logits, targets, logits_lengths, targets_lengths):
        logits = jnp.asarray(logits, jnp.float32)
        targets = jnp.asarray(targets, jnp.int32)
        B, T, C = logits.shape

        # hot path 1: fused log_softmax + argmax Pallas kernel
        logp, preds = log_softmax_and_argmax(logits)

        logits_np = np.asarray(jax.device_get(logits))
        logp_np = np.asarray(jax.device_get(logp))
        preds_np = np.asarray(jax.device_get(preds)).astype(np.int64)
        targets_np = np.asarray(jax.device_get(targets))
        ll_np = np.asarray(jax.device_get(jnp.asarray(logits_lengths))).astype(np.int64)
        tl_np = np.asarray(jax.device_get(jnp.asarray(targets_lengths))).astype(np.int64)

        # TODO(synk): get_alignment_3d (CTC Viterbi forced alignment + backtracking) and
        # the segment-boundary bookkeeping below are data-dependent host control flow
        # with no clean Pallas equivalent; they run on the host in numpy.
        targets_aligned = get_alignment_3d(logp_np, targets_np, ll_np, tl_np, self.blank_idx)

        mask = np.ones((B, T), dtype=np.uint8)
        for i in range(B):
            start = int(ll_np[i])
            if start < T:
                mask[i, start:] = 0
        targets_well_recognized = (targets_aligned == preds_np) * mask

        indices_to_segment = [[0] for _ in range(B)]
        num_segments = 0
        for i in range(B):
            start_space = -1
            all_word_well_recognized = True
            current_word_length = 0
            last_word_char = -1
            last_word_char_is_blank = False
            for t in range(int(ll_np[i])):
                if targets_well_recognized[i, t] == 0:
                    all_word_well_recognized = False
                    continue
                if targets_aligned[i, t] == self.space_idx:
                    if all_word_well_recognized and current_word_length >= self.min_word_length:
                        if start_space != -1 and indices_to_segment[i][-1] != start_space:
                            if start_space - indices_to_segment[i][-1] > 1:
                                num_segments += 1
                            indices_to_segment[i].append(start_space)
                            num_segments += 1
                        if t > 0:
                            indices_to_segment[i].append(t)
                            num_segments += 1
                            if t - start_space > 1:
                                num_segments += 1
                    start_space = t
                    all_word_well_recognized = True
                    current_word_length = 0
                    last_word_char = -1
                    last_word_char_is_blank = False
                elif targets_aligned[i, t] == self.blank_idx:
                    last_word_char_is_blank = True
                else:
                    if last_word_char_is_blank or targets_aligned[i, t] != last_word_char:
                        current_word_length += 1
                    last_word_char = int(targets_aligned[i, t])
                    last_word_char_is_blank = False
            if indices_to_segment[i][-1] != int(ll_np[i]) - 1:
                indices_to_segment[i].append(int(ll_np[i]) - 1)
                num_segments += 1

        assert num_segments >= B
        if num_segments == B:
            # hot path 2: fused CTC Pallas kernel on the full batch; reuse the logp
            # already produced by kernel A (skips a redundant in-kernel softmax).
            return ctc_loss(logp, targets, ll_np, tl_np, self.blank_idx,
                            inputs_are_log_probs=True)

        Lmax = targets_np.shape[1]
        logits_new = np.zeros((num_segments, T, C), dtype=np.float32)
        targets_new = np.zeros((num_segments, Lmax), dtype=np.int64)
        batch_ids_new = []
        logits_lengths_new = []
        targets_lengths_new = []
        new_i = 0
        for i in range(B):
            if len(indices_to_segment[i]) <= 2:
                logits_new[new_i] = logits_np[i]
                batch_ids_new.append(i)
                targets_new[new_i] = targets_np[i]
                targets_lengths_new.append(int(tl_np[i]))
                logits_lengths_new.append(int(ll_np[i]))
                new_i += 1
            else:
                for k, start in enumerate(indices_to_segment[i][:-1]):
                    if start != 0:
                        batch_ids_new.append(i)
                        targets_new[new_i, 0] = targets_aligned[i, start]
                        logits_new[new_i, 0:1] = logits_np[i, start:start + 1]
                        logits_lengths_new.append(1)
                        targets_lengths_new.append(1)
                        start += 1
                        new_i += 1
                    nxt = indices_to_segment[i][k + 1]
                    if k < len(indices_to_segment[i]) - 2:
                        nxt -= 1
                    if nxt < start:
                        continue
                    batch_ids_new.append(i)
                    logits_new[new_i, :nxt - start + 1] = logits_np[i, start:nxt + 1]
                    current_targets = [c for c, _ in itertools.groupby(
                        targets_aligned[i, start:nxt + 1].tolist()) if c != self.blank_idx]
                    if len(current_targets) > 0:
                        targets_new[new_i, :len(current_targets)] = current_targets
                    logits_lengths_new.append(nxt - start + 1)
                    targets_lengths_new.append(len(current_targets))
                    new_i += 1
        assert num_segments == len(batch_ids_new), \
            'expected {}, get {} segments: {}'.format(num_segments, len(batch_ids_new),
                                                      indices_to_segment)

        segmented_loss = ctc_loss(jnp.asarray(logits_new),
                                  jnp.asarray(targets_new, dtype=jnp.int32),
                                  np.asarray(logits_lengths_new, dtype=np.int64),
                                  np.asarray(targets_lengths_new, dtype=np.int64),
                                  self.blank_idx)
        segmented_loss = np.asarray(jax.device_get(segmented_loss))
        loss = np.zeros(B, dtype=np.float32)
        for seg_i, i in enumerate(batch_ids_new):
            loss[i] = segmented_loss[seg_i] + loss[i]
        return jnp.asarray(loss)


# --------------------------------------------------------------------------
# Pure-numpy reference (used only in the self-test below)
# --------------------------------------------------------------------------
def _np_ctc_ref(logits, targets, logits_lengths, targets_lengths, blank_idx=0):
    logits = np.asarray(logits, np.float64)
    targets = np.asarray(targets)
    N = logits.shape[0]
    out = np.zeros(N, np.float64)
    for i in range(N):
        Tb, Lb = int(logits_lengths[i]), int(targets_lengths[i])
        x = logits[i]
        m = x.max(axis=-1, keepdims=True)
        lp = x - m - np.log(np.exp(x - m).sum(axis=-1, keepdims=True))
        ext = [blank_idx]
        for c in targets[i][:Lb]:
            ext.extend([int(c), blank_idx])
        S = len(ext)
        alpha = np.full(S, -np.inf)
        alpha[0] = lp[0, ext[0]]
        if S > 1:
            alpha[1] = lp[0, ext[1]]
        for t in range(1, Tb):
            new = np.full(S, -np.inf)
            for s in range(S):
                cands = [alpha[s]]
                if s >= 1:
                    cands.append(alpha[s - 1])
                if s >= 2 and ext[s] != blank_idx and ext[s] != ext[s - 2]:
                    cands.append(alpha[s - 2])
                mm = max(cands)
                if np.isfinite(mm):
                    new[s] = mm + np.log(sum(np.exp(c - mm) for c in cands)) + lp[t, ext[s]]
            alpha = new
        ends = [alpha[S - 1]] + ([alpha[S - 2]] if S >= 2 else [])
        mm = max(ends)
        out[i] = -(mm + np.log(sum(np.exp(e - mm) for e in ends)))
    return out


# --------------------------------------------------------------------------
if __name__ == "__main__":
    key = jax.random.PRNGKey(0)
    B, T, C, L = 2, 16, 8, 6
    space_idx, blank_idx = 1, 0

    logits = jax.random.normal(key, (B, T, C), dtype=jnp.float32) * 2.0
    targets = jnp.array([[2, 3, 4, 1, 5, 6],
                         [3, 4, 1, 5, 6, 0]], dtype=jnp.int32)
    logits_lengths = np.array([16, 14], dtype=np.int64)
    targets_lengths = np.array([6, 5], dtype=np.int64)

    # --- kernel A vs numpy log_softmax / argmax
    logp, preds = log_softmax_and_argmax(logits)
    x64 = np.asarray(logits, np.float64)
    m64 = x64.max(-1, keepdims=True)
    ref_logp = x64 - m64 - np.log(np.exp(x64 - m64).sum(-1, keepdims=True))
    assert np.allclose(np.asarray(logp), ref_logp, atol=1e-3)
    assert np.array_equal(np.asarray(preds), ref_logp.argmax(-1))

    # --- fused CTC kernel vs numpy CTC (raw logits and log-prob inputs,
    #     single-time-tile and multi-time-tile configurations)
    ref = _np_ctc_ref(np.asarray(logits), np.asarray(targets),
                      logits_lengths, targets_lengths, blank_idx)
    for tt_cap in (None, 8):
        loss_raw = jax.block_until_ready(
            ctc_loss(logits, targets, logits_lengths, targets_lengths, blank_idx,
                     max_time_tile=tt_cap))
        loss_lp = jax.block_until_ready(
            ctc_loss(logp, targets, logits_lengths, targets_lengths, blank_idx,
                     inputs_are_log_probs=True, max_time_tile=tt_cap))
        assert np.allclose(np.asarray(loss_raw), ref, rtol=2e-3, atol=5e-2)
        assert np.allclose(np.asarray(loss_lp), ref, rtol=2e-3, atol=5e-2)

    # --- edge cases: short segment + empty target (exercises the tile-skip /
    #     clamped-index-map path when multi-tiled)
    ll_edge = np.array([3, 1], dtype=np.int64)
    tl_edge = np.array([2, 0], dtype=np.int64)
    ref_edge = _np_ctc_ref(np.asarray(logits), np.asarray(targets),
                           ll_edge, tl_edge, blank_idx)
    for tt_cap in (None, 8):
        loss_edge = jax.block_until_ready(
            ctc_loss(logits, targets, ll_edge, tl_edge, blank_idx,
                     max_time_tile=tt_cap))
        assert np.allclose(np.asarray(loss_edge), ref_edge, rtol=2e-3, atol=5e-2)

    # --- multi-group (NG >= 2), multi-tile, non-uniform lengths
    k1, k2, k3 = jax.random.split(jax.random.PRNGKey(1), 3)
    B2, T2, C2, L2 = 10, 24, 16, 5
    logits2 = jax.random.normal(k1, (B2, T2, C2), dtype=jnp.float32) * 1.5
    targets2 = jax.random.randint(k2, (B2, L2), 1, C2, dtype=jnp.int32)
    ll2 = np.asarray(jax.random.randint(k3, (B2,), 12, T2 + 1)).astype(np.int64)
    tl2 = np.clip(ll2 // 4, 1, L2).astype(np.int64)
    ref2 = _np_ctc_ref(np.asarray(logits2), np.asarray(targets2), ll2, tl2, blank_idx)
    loss2 = jax.block_until_ready(
        ctc_loss(logits2, targets2, ll2, tl2, blank_idx, max_time_tile=8))
    assert np.allclose(np.asarray(loss2), ref2, rtol=2e-3, atol=5e-2)

    # --- full module forward
    module = CTCLossSegmentedPallas(space_idx=space_idx, blank_idx=blank_idx,
                                    reduce=False, min_word_length=3)
    loss = module.forward(logits, targets, logits_lengths, targets_lengths)
    loss = jax.block_until_ready(jnp.asarray(loss))
    assert loss.shape == (B,)
    assert bool(jnp.all(jnp.isfinite(loss)))
    print("KERNEL_OK")
</pallas_src>

<mosaic_0001>
module attributes {stable_mosaic.version = 11 : i64} {
  func.func @_lsm_argmax_kernel(%arg0: i32, %arg1: i32, %arg2: memref<1x16x8xf32, #tpu.memory_space<vmem>>, %arg3: memref<1x16x8xf32, #tpu.memory_space<vmem>>, %arg4: memref<1x16x1xi32, #tpu.memory_space<vmem>>) attributes {dimension_semantics = [#tpu.dimension_semantics<parallel>, #tpu.dimension_semantics<parallel>], iteration_bounds = array<i64: 2, 1>, scalar_prefetch = 0 : i64, scratch_operands = 0 : i64, tpu.core_type = #tpu.core_type<tc>, window_params = [{transform_indices = @transform_0, window_bounds = array<i64: 1, 16, 8>}, {transform_indices = @transform_1, window_bounds = array<i64: 1, 16, 8>}, {transform_indices = @transform_2, window_bounds = array<i64: 1, 16, 1>}]} {
    %c0 = arith.constant 0 : index
    %c0_0 = arith.constant 0 : index
    %c0_1 = arith.constant 0 : index
    %0 = vector.load %arg2[%c0, %c0_0, %c0_1] : memref<1x16x8xf32, #tpu.memory_space<vmem>>, vector<1x16x8xf32>
    %1 = vector.shape_cast %0 : vector<1x16x8xf32> to vector<16x8xf32>
    %cst = arith.constant dense<0xFF800000> : vector<16xf32>
    %2 = vector.multi_reduction <maximumf>, %1, %cst [1] : vector<16x8xf32> to vector<16xf32>
    %3 = vector.shape_cast %2 : vector<16xf32> to vector<16x1xf32>
    %4 = vector.broadcast %3 : vector<16x1xf32> to vector<16x8xf32>
    %5 = arith.subf %1, %4 : vector<16x8xf32>
    %6 = math.exp %5 : vector<16x8xf32>
    %cst_2 = arith.constant dense<0.000000e+00> : vector<16xf32>
    %7 = vector.multi_reduction <add>, %6, %cst_2 [1] : vector<16x8xf32> to vector<16xf32>
    %8 = vector.shape_cast %7 : vector<16xf32> to vector<16x1xf32>
    %9 = math.log %8 : vector<16x1xf32>
    %10 = vector.broadcast %9 : vector<16x1xf32> to vector<16x8xf32>
    %11 = arith.subf %5, %10 : vector<16x8xf32>
    %12 = vector.shape_cast %11 : vector<16x8xf32> to vector<1x16x8xf32>
    %c0_3 = arith.constant 0 : index
    %c0_4 = arith.constant 0 : index
    %c0_5 = arith.constant 0 : index
    %13 = vector.load %arg3[%c0_3, %c0_4, %c0_5] : memref<1x16x8xf32, #tpu.memory_space<vmem>>, vector<1x16x8xf32>
    tpu.vector_store %arg3[%c0_3, %c0_4, %c0_5], %12 {strides = array<i32>} : memref<1x16x8xf32, #tpu.memory_space<vmem>>, vector<1x16x8xf32>,
    %14 = tpu.iota {dimensions = array<i32: 1>} : vector<16x8xi32>
    %15 = vector.broadcast %3 : vector<16x1xf32> to vector<16x8xf32>
    %16 = arith.cmpf oge, %1, %15 : vector<16x8xf32>
    %c8_i32 = arith.constant 8 : i32
    %17 = vector.broadcast %c8_i32 : i32 to vector<16x8xi32>
    %18 = arith.select %16, %14, %17 : vector<16x8xi1>, vector<16x8xi32>
    %cst_6 = arith.constant dense<2147483647> : vector<16xi32>
    %19 = vector.multi_reduction <minsi>, %18, %cst_6 [1] : vector<16x8xi32> to vector<16xi32>
    %20 = vector.shape_cast %19 : vector<16xi32> to vector<16x1xi32>
    %21 = vector.shape_cast %20 : vector<16x1xi32> to vector<1x16x1xi32>
    %c0_7 = arith.constant 0 : index
    %c0_8 = arith.constant 0 : index
    %c0_9 = arith.constant 0 : index
    %22 = vector.load %arg4[%c0_7, %c0_8, %c0_9] : memref<1x16x1xi32, #tpu.memory_space<vmem>>, vector<1x16x1xi32>
    tpu.vector_store %arg4[%c0_7, %c0_8, %c0_9], %21 {strides = array<i32>} : memref<1x16x1xi32, #tpu.memory_space<vmem>>, vector<1x16x1xi32>,
    return
  }
  func.func @transform_0(%arg0: i32, %arg1: i32) -> (i32, i32, i32) {
    %c0_i32 = arith.constant 0 : i32
    %c0_i32_0 = arith.constant 0 : i32
    return %arg0, %arg1, %c0_i32 : i32, i32, i32
  }
  func.func @transform_1(%arg0: i32, %arg1: i32) -> (i32, i32, i32) {
    %c0_i32 = arith.constant 0 : i32
    %c0_i32_0 = arith.constant 0 : i32
    return %arg0, %arg1, %c0_i32 : i32, i32, i32
  }
  func.func @transform_2(%arg0: i32, %arg1: i32) -> (i32, i32, i32) {
    %c0_i32 = arith.constant 0 : i32
    %c0_i32_0 = arith.constant 0 : i32
    return %arg0, %arg1, %c0_i32 : i32, i32, i32
  }
}

</mosaic_0001>

<bundles_post_ra>
// kernel: tpu_custom_call.1
= control target key start
LH: loop header
LB: loop body
LE: loop exit
PB: predicated region body
PF: predicated region fallthrough
CT: control target
= control target key end

     0   :  { %s499_s9 = smov 0   ;;  %s501_s10 = smov 0   ;;  %s548_s0 = inlined_call_operand.vmem [shape: f32[2,16,8], index: 0, kind: input, shape index: {}]   ;;  %s549_s1 = inlined_call_operand.vmem [shape: f32[2,16,8], index: 1, kind: output, shape index: {0}]   ;;  %s550_s2 = inlined_call_operand.vmem [shape: s32[2,16,1], index: 2, kind: output, shape index: {1}]  }
   0x1   :  { %s503_s11 = smov 0  }
   0x2 LB: > { %s25_s12 = sadd.s32 1, %s478_s10  ;;  %p416_p0 = scmp.ge.s32.totalorder %s482_s11, 1  ;;  %s482_s11 = sphi %s503_s11, %s13_s11   ;;  %s478_s10 = sphi %s501_s10, %s552_s10   ;;  %s474_s9 = sphi %s499_s9, %s551_s9  }
   0x3   : > { %p27_p1 = scmp.ge.s32.totalorder %s25_s12, 2  ;;  %p138_p2 = scmp.lt.s32.totalorder %s482_s11, 3 }
   0x5   : > { %s554_s12 = smov (%p27_p1, %s25_s12), 0  ;;  %p139_p3 = pnand %p416_p0, %p138_p2 }
   0x6   : > { %p178_p4 = scmp.lt.s32.totalorder (!%p139_p3), %s474_s9, 1 }
   0x7   : > { %142 = sbr.rel (%p139_p3) target bundleno = 449 (0x1c1), region = 24 }
   0xc   : > { %s556_s9 = smov (!%p178_p4, %s474_s9), 1  ;;  %vm209_vm0 = vcmask 64512   ;;  %v236_v4 = vlaneseq  ;;  %vm272_vm5 = vcmask 7168  }
   0xd   : > { %s517_s13 = sshll.u32 %s556_s9, 4 }
   0xe   : > { %s185_s16 = scalar_lea.vmem %s548_s0, %s517_s13  ;;  %v237_v5 = vand.u32 127, %v236_v4  ;;  %s195_s19 = scalar_lea.vmem %s549_s1, %s517_s13 }
   0xf   : > { %v207_v0 = vld [vmem:[%s185_s16] sm:$0xff]  ;;  %v208_v1 = vld [vmem:[%s185_s16 + $0x8] sm:$0xff]  ;;  %s205_s22 = scalar_lea.vmem %s550_s2, %s517_s13 }
  0x10   : > { %v210_v2 = vsel %vm209_vm0, %v207_v0, -inf  ;;  %v213_v3 = vsel %vm209_vm0, %v208_v1, -inf }
  0x11   : > { %211 = vmax.xlane.f32.xlu0 %v210_v2 }
  0x15   : > { %214 = vmax.xlane.f32.xlu0 %v213_v3 }
  0x9a   : > { %v212_v6 = vpop.xlane.xlu0 %211 }
  0x9b   : > { %v216_v7 = vsub.f32 %v207_v0, %v212_v6  ;;  %vm238_vm1 = vcmp.ge.f32.partialorder %v207_v0, %v212_v6 }
  0x9c   : > { %v240_v8 = vsel %vm238_vm1, %v237_v5, 8 }
  0x9d   : > { %v218_v9 = vmul.f32 1.442695, %v216_v7  ;;  %v242_v10 = vsel %vm209_vm0, %v240_v8, 2147483647 }
  0x9e   : > { %v215_v11 = vpop.xlane.xlu0 %214  ;;  %v244_v12 = vshra.s32 %v242_v10, 16  ;;  %v243_v24 = vand.u32 65535, %v242_v10 }
  0x9f   : > { %452 = vpow2.f32 %v218_v9  ;;  %v217_v13 = vsub.f32 %v208_v1, %v215_v11  ;;  %vm239_vm2 = vcmp.ge.f32.partialorder %v208_v1, %v215_v11 }
  0xa0   : > { %v241_v14 = vsel %vm239_vm2, %v237_v5, 8  ;;  %v246_v15 = vcvt.s32.f32 %v244_v12  ;;  %v245_v26 = vcvt.s32.f32 %v243_v24 }
  0xa1   : > { %v220_v16 = vmul.f32 1.442695, %v217_v13  ;;  %v257_v17 = vsel %vm209_vm0, %v241_v14, 2147483647 }
  0xa2   : > { %247 = vmin.xlane.f32.xlu1 %v246_v15  ;;  %v259_v18 = vshra.s32 %v257_v17, 16  ;;  %v258_v27 = vand.u32 65535, %v257_v17 }
  0xa3   : > { %454 = vpow2.f32 %v220_v16 }
  0xa4   : > { %v261_v19 = vcvt.s32.f32 %v259_v18  ;;  %v260_v30 = vcvt.s32.f32 %v258_v27 }
  0xa6   : > { %262 = vmin.xlane.f32.xlu1 %v261_v19 }
  0xac   : > { %v453_v20 = vpop.eup %452 }
  0xad   : > { %v222_v21 = vsel %vm209_vm0, %v453_v20, 0.0 }
  0xae   : > { %223 = vadd.xlane.f32.xlu0 %v222_v21 }
  0xb0   : > { %v455_v22 = vpop.eup %454 }
  0xb1   : > { %v225_v23 = vsel %vm209_vm0, %v455_v22, 0.0 }
  0xb2   : > { %226 = vadd.xlane.f32.xlu1 %v225_v23 }
 0x12b   : > { %v248_v25 = vpop.xlane.xlu1 %247 }
 0x12c   : > { %vm249_vm3 = vcmp.eq.f32.partialorder %v246_v15, %v248_v25  ;;  %v254_v40 = vcvt.f32.s32 %v248_v25 }
 0x12d   : > { %v250_v28 = vsel %vm249_vm3, %v245_v26, inf }
 0x12e   : > { %251 = vmin.xlane.f32.xlu0 %v250_v28  ;;  %v255_v42 = vshll.u32 %v254_v40, 16 }
 0x12f   : > { %v263_v29 = vpop.xlane.xlu1 %262 }
 0x130   : > { %vm264_vm4 = vcmp.eq.f32.partialorder %v261_v19, %v263_v29  ;;  %v269_v43 = vcvt.f32.s32 %v263_v29 }
 0x131   : > { %v265_v31 = vsel %vm264_vm4, %v260_v30, inf }
 0x132   : > { %266 = vmin.xlane.f32.xlu1 %v265_v31  ;;  %v270_v47 = vshll.u32 %v269_v43, 16 }
 0x137   : > { %v224_v32 = vpop.xlane.xlu0 %223 }
 0x138   : > { %456 = vlog2.f32 %v224_v32 }
 0x13b   : > { %v227_v33 = vpop.xlane.xlu1 %226 }
 0x13c   : > { %458 = vlog2.f32 %v227_v33 }
 0x145   : > { %v457_v34 = vpop.eup %456 }
 0x146   : > { %v229_v35 = vmul.f32 0.6931472, %v457_v34 }
 0x148   : > { %v232_v36 = vsub.f32 %v216_v7, %v229_v35 }
 0x149   : > { %v459_v37 = vpop.eup %458 }
 0x14a   : > { %234 = vst.msk [vmem:[%s195_s19] sm:$0xff] %vm209_vm0, %v232_v36  ;;  %v231_v38 = vmul.f32 0.6931472, %v459_v37 }
 0x14c   : > { %v233_v39 = vsub.f32 %v217_v13, %v231_v38 }
 0x14e   : > { %235 = vst.msk [vmem:[%s195_s19 + $0x8] sm:$0xff] %vm209_vm0, %v233_v39 }
 0x1b7   : > { %v252_v41 = vpop.xlane.xlu0 %251 }
 0x1b8   : > { %v253_v44 = vcvt.f32.s32 %v252_v41 }
 0x1ba   : > { %v256_v45 = vadd.s32 %v255_v42, %v253_v44 }
 0x1bb   : > { %v267_v46 = vpop.xlane.xlu1 %266 }
 0x1bc   : > { %273 = vst.msk [vmem:[%s205_s22] sm:$0xff] %vm272_vm5, %v256_v45  ;;  %v268_v48 = vcvt.f32.s32 %v267_v46 }
 0x1be   : > { %v271_v49 = vadd.s32 %v270_v47, %v268_v48 }
 0x1c0   : > { %274 = vst.msk [vmem:[%s205_s22 + $0x8] sm:$0xff] %vm272_vm5, %v271_v49 }
 0x1c1 PF: > { %s13_s11 = sadd.s32 1, %s482_s11   ;;  %s551_s9 = smov %s478_s10 }
 0x1c2   : > { %p10_p5 = scmp.ge.s32.totalorder %s13_s11, 4   ;;  %s552_s10 = smov %s554_s12 }
 0x1c4   :  { %12 = sbr.rel (!%p10_p5) target bundleno = 2 (0x2), region = 66 }

</bundles_post_ra>
